<compile_context>
chip_gen: v7x
topology: tpu7x:2x2x1
jax: 0.10.0
libtpu: 0.0.40
codegen_flags: <defaults>
</compile_context>

<pallas_src>
import functools
import math
from typing import NamedTuple

import jax
import jax.numpy as jnp
from jax.experimental import pallas as pl
from jax.experimental.pallas import tpu as pltpu


def _round_up(n, m):
    return ((n + m - 1) // m) * m


class DecoderMeta(NamedTuple):
    E: int      # embed size (== out_dim for this module)
    H: int      # hidden size
    od: int     # out_dim
    rA: int     # row offset: [wh_t | whh_t]        (H, 4H)
    rB: int     # row offset: [wih_c_t | wout_c_t]  (H, 3H+od)
    rC: int     # row offset: wih_x_t               (E, 3H)
    rD: int     # row offset: we_t                  (H, H)
    rE: int     # row offset: wout_h_t              (H, od)
    rF: int     # row offset: bias rows (battn, v, bih, bhh, bout)
    lanes: int  # lane width of the slab


def prepare_params(params, embed_size):
    """One-time packing of all weights/biases into a single lane-padded slab.

    Run once outside the decode loop; the returned slab is the only weight
    operand the kernel needs (all transposes are hoisted here).
    """
    H = params["w_hh"].shape[1]
    od = params["w_out"].shape[0]
    E = int(embed_size)
    H3 = 3 * H

    lanes = _round_up(max(4 * H, H3 + od, 128), 128)
    rA = 0
    rB = rA + _round_up(H, 8)
    rC = rB + _round_up(H, 8)
    rD = rC + _round_up(E, 8)
    rE = rD + _round_up(H, 8)
    rF = rE + _round_up(H, 8)
    rows = rF + 8

    w_attn = params["w_attn"]          # (H, 2H)
    w_ih = params["w_ih"]              # (3H, E+H)  input = cat[x, context]
    w_out = params["w_out"]            # (od, 2H)   input = cat[output, context]

    w = jnp.zeros((rows, lanes), jnp.float32)
    w = w.at[rA:rA + H, 0:H].set(jnp.transpose(w_attn[:, :H]))          # wh_t
    w = w.at[rA:rA + H, H:4 * H].set(jnp.transpose(params["w_hh"]))     # whh_t
    w = w.at[rB:rB + H, 0:H3].set(jnp.transpose(w_ih[:, E:]))           # wih_c_t
    w = w.at[rB:rB + H, H3:H3 + od].set(jnp.transpose(w_out[:, H:]))    # wout_c_t
    w = w.at[rC:rC + E, 0:H3].set(jnp.transpose(w_ih[:, :E]))           # wih_x_t
    w = w.at[rD:rD + H, 0:H].set(jnp.transpose(w_attn[:, H:]))          # we_t
    w = w.at[rE:rE + H, 0:od].set(jnp.transpose(w_out[:, :H]))          # wout_h_t
    w = w.at[rF + 0, 0:H].set(params["b_attn"])
    w = w.at[rF + 1, 0:H].set(params["v"])
    w = w.at[rF + 2, 0:H3].set(params["b_ih"])
    w = w.at[rF + 3, 0:H3].set(params["b_hh"])
    w = w.at[rF + 4, 0:od].set(params["b_out"])

    meta = DecoderMeta(E=E, H=H, od=od, rA=rA, rB=rB, rC=rC,
                       rD=rD, rE=rE, rF=rF, lanes=lanes)
    return w, meta


def prepare_encoder(encoder_outputs):
    """One-time relayout of encoder outputs to batch-major flat (B*S, H).

    Hoisted out of the per-step path (encoder outputs are constant over decode).
    Row b*S + s corresponds to encoder_outputs[s, b, :].
    """
    S, B, H = encoder_outputs.shape
    return jnp.transpose(encoder_outputs, (1, 0, 2)).reshape(B * S, H)


def _decoder_step_kernel(w_ref, h0_ref, enc_ref, x_ref, out_ref, h_scr,
                         *, B, S, meta):
    """One decode step; runs once per grid step t with weights/enc VMEM-resident."""
    E, H, od = meta.E, meta.H, meta.od
    rA, rB, rC, rD, rE, rF = meta.rA, meta.rB, meta.rC, meta.rD, meta.rE, meta.rF
    H2, H3, H4 = 2 * H, 3 * H, 4 * H

    # Hidden-state carry lives in VMEM scratch; seeded from h0 on the first step.
    @pl.when(pl.program_id(0) == 0)
    def _():
        h_scr[...] = h0_ref[...]

    x = x_ref[0]                               # (B, E)   this step's input
    h = h_scr[...]                             # (B, H)   carried hidden state
    enc = enc_ref[...]                         # (B*S, H) batch-major rows b*S + s

    battn = w_ref[rF + 0:rF + 1, 0:H]          # (1, H)
    v_row = w_ref[rF + 1:rF + 2, 0:H]          # (1, H)
    bih = w_ref[rF + 2:rF + 3, 0:H3]           # (1, 3H)
    bhh = w_ref[rF + 3:rF + 4, 0:H3]           # (1, 3H)
    bout = w_ref[rF + 4:rF + 5, 0:od]          # (1, od)

    # ---- fused h-LHS matmul: [hb | gh] = h @ [wh_t | whh_t]  (one (H,4H) MXU pass)
    hcat = jnp.dot(h, w_ref[rA:rA + H, 0:H4], preferred_element_type=jnp.float32)
    hb = hcat[:, 0:H]                          # attention: h @ Wh^T
    gh = hcat[:, H:H4] + bhh                   # GRU:       h @ Whh^T + b_hh

    # ---- attention energies (flat matmul; the reshape is free when S % 8 == 0,
    #      for other S it is still correct, just an in-kernel relayout)
    ep = jnp.dot(enc, w_ref[rD:rD + H, 0:H], preferred_element_type=jnp.float32)
    enc3 = enc.reshape(B, S, H)
    energy = ep.reshape(B, S, H) + hb[:, None, :] + battn[None, :, :]   # (B,S,H)
    # torch F.softmax with implicit dim on a 3-D (batch, seq, hidden) tensor -> dim 0.
    m = jnp.max(energy, axis=0, keepdims=True)
    e = jnp.exp(energy - m)
    p = e * pl.reciprocal(jnp.sum(e, axis=0, keepdims=True), approx=True)
    score = jnp.sum(p * v_row[None, :, :], axis=-1)                     # (B, S)
    attw = jnp.maximum(score, 0.0)
    context = jnp.sum(attw[:, :, None] * enc3, axis=1)                  # (B, H)

    # ---- single GRU step (PyTorch gate order r, z, n); split matmuls, no concat
    gix = jnp.dot(x, w_ref[rC:rC + E, 0:H3], preferred_element_type=jnp.float32)
    # fused context-LHS matmul: GRU-input part + output-projection part
    ccat = jnp.dot(context, w_ref[rB:rB + H, 0:H3 + od],
                   preferred_element_type=jnp.float32)
    gi = gix + ccat[:, 0:H3] + bih
    r = jax.nn.sigmoid(gi[:, 0:H] + gh[:, 0:H])
    z = jax.nn.sigmoid(gi[:, H:H2] + gh[:, H:H2])
    n = jnp.tanh(gi[:, H2:H3] + r * gh[:, H2:H3])
    hnew = (1.0 - z) * n + z * h

    # ---- output projection: hnew part + context part (context part already in ccat)
    outp = (jnp.dot(hnew, w_ref[rE:rE + H, 0:od], preferred_element_type=jnp.float32)
            + ccat[:, H3:H3 + od] + bout)

    # carry hidden state to the next grid step
    h_scr[...] = hnew

    # ---- lane-dense (1, B, 128) output block: direct sub-slice stores (no concat)
    out_ref[:, :, 0:od] = outp[None]
    out_ref[:, :, od:od + H] = hnew[None]
    out_ref[:, :, od + H:od + H + S] = attw[None]
    pad = out_ref.shape[2] - (od + H + S)
    if pad:                                    # keep pad lanes deterministic
        out_ref[:, :, od + H + S:] = jnp.zeros((1, B, pad), jnp.float32)


@functools.partial(jax.jit, static_argnums=(4,))
def _decode_steps(wslab, xs, h0, enc_bm, meta):
    """T decode steps in one pallas_call; weights/enc resident, h carried in VMEM."""
    T, B, E = xs.shape
    BS, H = enc_bm.shape
    assert E == meta.E and H == meta.H and BS % B == 0
    S = BS // B
    od = meta.od
    out_w = _round_up(od + H + S, 128)

    slab = pl.pallas_call(
        functools.partial(_decoder_step_kernel, B=B, S=S, meta=meta),
        out_shape=jax.ShapeDtypeStruct((T, B, out_w), jnp.float32),
        grid=(T,),
        in_specs=[
            # Constant index_maps: DMA'd once, VMEM-resident across all T steps.
            pl.BlockSpec(wslab.shape, lambda t: (0, 0)),
            pl.BlockSpec(h0.shape, lambda t: (0, 0)),
            pl.BlockSpec(enc_bm.shape, lambda t: (0, 0)),
            # Per-step decoder input, streamed one (1, B, E) block per grid step.
            pl.BlockSpec((1, B, E), lambda t: (t, 0, 0)),
        ],
        out_specs=pl.BlockSpec((1, B, out_w), lambda t: (t, 0, 0)),
        scratch_shapes=[pltpu.VMEM((B, H), jnp.float32)],   # hidden-state carry
        compiler_params=pltpu.CompilerParams(
            dimension_semantics=("arbitrary",),   # h is carried step -> step
            vmem_limit_bytes=4 * 1024 * 1024,     # actual footprint < 1 MiB
        ),
    )(wslab, h0, enc_bm, xs)

    outs = slab[:, :, 0:od]
    hiddens = slab[:, :, od:od + H]
    attws = slab[:, :, od + H:od + H + S]
    return outs, hiddens, attws


def decoder_decode(wslab, xs, last_hidden, enc_bm, meta):
    """Multi-step decode (the fast path): xs (T,B,E), last_hidden (1,B,H),
    enc_bm (B*S,H) from prepare_encoder().  Returns per-step
    (outs (T,B,od), hiddens (T,B,H), attws (T,B,S))."""
    return _decode_steps(wslab, xs, last_hidden[-1], enc_bm, meta)


def decoder_forward(wslab, x_in, last_hidden, encoder_outputs, meta):
    """Single-step Decoder.forward with the PyTorch module's shapes.

    x_in: (1,B,E), last_hidden: (n_layers,B,H), encoder_outputs: (S,B,H).
    Returns out (1,B,od), hidden (1,B,H), atten_weights (B,1,S).
    For an actual decode loop use prepare_encoder() + decoder_decode() instead.
    """
    enc_bm = prepare_encoder(encoder_outputs)
    outs, hiddens, attws = _decode_steps(wslab, x_in, last_hidden[-1], enc_bm, meta)
    return outs[0][None], hiddens[0][None], attws[0][:, None, :]


def reference_forward(x_in, last_hidden, enc, params):
    """Pure-JAX mirror of the PyTorch Decoder.forward (batch-major like torch)."""
    H = last_hidden.shape[-1]
    h = last_hidden[-1]                                    # (B, H)
    B = h.shape[0]
    S = enc.shape[0]
    enc_b = jnp.transpose(enc, (1, 0, 2))                  # (B, S, H)
    hrep = jnp.broadcast_to(h[:, None, :], (B, S, H))
    energy = jnp.concatenate([hrep, enc_b], axis=2) @ params["w_attn"].T + params["b_attn"]
    energy = jax.nn.softmax(energy, axis=0)                # legacy implicit dim=0
    score = jnp.einsum("bsh,h->bs", energy, params["v"])
    attw = jax.nn.relu(score)[:, None, :]                  # (B, 1, S)
    context = jnp.matmul(attw, enc_b)                      # (B, 1, H)
    context_t = jnp.transpose(context, (1, 0, 2))          # (1, B, H)
    rnn_in = jnp.concatenate([x_in, context_t], axis=2)[0]  # (B, E+H)
    gi = rnn_in @ params["w_ih"].T + params["b_ih"]
    gh = h @ params["w_hh"].T + params["b_hh"]
    r = jax.nn.sigmoid(gi[:, :H] + gh[:, :H])
    z = jax.nn.sigmoid(gi[:, H:2 * H] + gh[:, H:2 * H])
    n = jnp.tanh(gi[:, 2 * H:] + r * gh[:, 2 * H:])
    hnew = (1.0 - z) * n + z * h
    out = jnp.concatenate([hnew, context_t[0]], axis=1) @ params["w_out"].T + params["b_out"]
    return out[None], hnew[None], attw


def init_params(key, hidden, out_dim):
    """Deterministic init mimicking the PyTorch module's parameter shapes."""
    ks = jax.random.split(key, 10)
    in_size = hidden + out_dim            # GRU input size (requires embed == out_dim)

    def u(k, shape, scale):
        return jax.random.uniform(k, shape, jnp.float32, -scale, scale)

    sa = 1.0 / math.sqrt(2 * hidden)
    sh = 1.0 / math.sqrt(hidden)
    so = 1.0 / math.sqrt(2 * hidden)
    return {
        "w_attn": u(ks[0], (hidden, 2 * hidden), sa),
        "b_attn": u(ks[1], (hidden,), sa),
        "v":      u(ks[2], (hidden,), sh),
        "w_ih":   u(ks[3], (3 * hidden, in_size), sh),
        "w_hh":   u(ks[4], (3 * hidden, hidden), sh),
        "b_ih":   u(ks[5], (3 * hidden,), sh),
        "b_hh":   u(ks[6], (3 * hidden,), sh),
        "w_out":  u(ks[7], (out_dim, 2 * hidden), so),
        "b_out":  u(ks[8], (out_dim,), so),
    }


if __name__ == "__main__":
    B, S, H = 2, 8, 32
    out_dim = 16
    embed = out_dim           # the module requires embed_size == out_dim for shapes to work
    T = 5                     # decode steps amortized over one grid-looped kernel

    key = jax.random.PRNGKey(0)
    kp, kx, kh, ke = jax.random.split(key, 4)
    params = init_params(kp, H, out_dim)

    xs = jax.random.normal(kx, (T, B, embed), jnp.float32)
    last_hidden = jax.random.normal(kh, (1, B, H), jnp.float32)
    encoder_outputs = jax.random.normal(ke, (S, B, H), jnp.float32)

    # One-time packing/relayout, hoisted out of the decode loop.
    wslab, meta = prepare_params(params, embed)
    enc_bm = prepare_encoder(encoder_outputs)

    # Multi-step decode: one pallas_call, grid=(T,), weights VMEM-resident.
    outs, hiddens, attws = decoder_decode(wslab, xs, last_hidden, enc_bm, meta)
    jax.block_until_ready((outs, hiddens, attws))

    # Tolerance slightly relaxed vs. pure f32 because the softmax denominator uses
    # the approximate EUP reciprocal (pl.reciprocal(..., approx=True)).
    tol = dict(atol=5e-3, rtol=5e-3)

    # Reference: apply the module forward T times, carrying the hidden state.
    h_ref = last_hidden
    for t in range(T):
        o_r, h_ref, a_r = reference_forward(xs[t][None], h_ref, encoder_outputs, params)
        assert jnp.allclose(outs[t], o_r[0], **tol)
        assert jnp.allclose(hiddens[t], h_ref[0], **tol)
        assert jnp.allclose(attws[t], a_r[:, 0, :], **tol)

    # Single-step API (exact Decoder.forward signature / output shapes).
    out1, hid1, att1 = decoder_forward(wslab, xs[0][None], last_hidden,
                                       encoder_outputs, meta)
    jax.block_until_ready((out1, hid1, att1))
    r_out, r_hid, r_att = reference_forward(xs[0][None], last_hidden,
                                            encoder_outputs, params)
    assert out1.shape == (1, B, out_dim)
    assert hid1.shape == (1, B, H)
    assert att1.shape == (B, 1, S)
    assert jnp.allclose(out1, r_out, **tol)
    assert jnp.allclose(hid1, r_hid, **tol)
    assert jnp.allclose(att1, r_att, **tol)

    print("KERNEL_OK")
</pallas_src>

<mosaic_0001>
module attributes {stable_mosaic.version = 11 : i64} {
  func.func @_decoder_step_kernel(%arg0: i32, %arg1: memref<152x128xf32, #tpu.memory_space<vmem>>, %arg2: memref<2x32xf32, #tpu.memory_space<vmem>>, %arg3: memref<16x32xf32, #tpu.memory_space<vmem>>, %arg4: memref<1x2x16xf32, #tpu.memory_space<vmem>>, %arg5: memref<1x2x128xf32, #tpu.memory_space<vmem>>, %arg6: memref<2x32xf32, #tpu.memory_space<vmem>>) attributes {dimension_semantics = [#tpu.dimension_semantics<arbitrary>], iteration_bounds = array<i64: 5>, scalar_prefetch = 0 : i64, scratch_operands = 1 : i64, tpu.core_type = #tpu.core_type<tc>, window_params = [{pipeline_mode = #tpu.pipeline_mode<synchronous>, transform_indices = @transform_0, window_bounds = array<i64: 152, 128>}, {pipeline_mode = #tpu.pipeline_mode<synchronous>, transform_indices = @transform_1, window_bounds = array<i64: 2, 32>}, {pipeline_mode = #tpu.pipeline_mode<synchronous>, transform_indices = @transform_2, window_bounds = array<i64: 16, 32>}, {transform_indices = @transform_3, window_bounds = array<i64: 1, 2, 16>}, {transform_indices = @transform_4, window_bounds = array<i64: 1, 2, 128>}]} {
    %c0_i32 = arith.constant 0 : i32
    %0 = arith.cmpi eq, %arg0, %c0_i32 : i32
    %1 = arith.extui %0 : i1 to i32
    %c0_i32_0 = arith.constant 0 : i32
    %2 = arith.cmpi ne, %1, %c0_i32_0 : i32
    scf.if %2 {
      %c0_42 = arith.constant 0 : index
      %c0_43 = arith.constant 0 : index
      %97 = vector.load %arg2[%c0_42, %c0_43] : memref<2x32xf32, #tpu.memory_space<vmem>>, vector<2x32xf32>
      %c0_44 = arith.constant 0 : index
      %c0_45 = arith.constant 0 : index
      %98 = vector.load %arg6[%c0_44, %c0_45] : memref<2x32xf32, #tpu.memory_space<vmem>>, vector<2x32xf32>
      tpu.vector_store %arg6[%c0_44, %c0_45], %97 {strides = array<i32>} : memref<2x32xf32, #tpu.memory_space<vmem>>, vector<2x32xf32>,
    } else {
    }
    %c0 = arith.constant 0 : index
    %c0_1 = arith.constant 0 : index
    %c0_2 = arith.constant 0 : index
    %3 = vector.load %arg4[%c0, %c0_1, %c0_2] : memref<1x2x16xf32, #tpu.memory_space<vmem>>, vector<1x2x16xf32>
    %4 = vector.shape_cast %3 : vector<1x2x16xf32> to vector<2x16xf32>
    %c0_3 = arith.constant 0 : index
    %c0_4 = arith.constant 0 : index
    %5 = vector.load %arg6[%c0_3, %c0_4] : memref<2x32xf32, #tpu.memory_space<vmem>>, vector<2x32xf32>
    %c0_5 = arith.constant 0 : index
    %c0_6 = arith.constant 0 : index
    %6 = vector.load %arg3[%c0_5, %c0_6] : memref<16x32xf32, #tpu.memory_space<vmem>>, vector<16x32xf32>
    %c144 = arith.constant 144 : index
    %c0_7 = arith.constant 0 : index
    %7 = vector.load %arg1[%c144, %c0_7] : memref<152x128xf32, #tpu.memory_space<vmem>>, vector<1x32xf32>
    %c145 = arith.constant 145 : index
    %c0_8 = arith.constant 0 : index
    %8 = vector.load %arg1[%c145, %c0_8] : memref<152x128xf32, #tpu.memory_space<vmem>>, vector<1x32xf32>
    %c146 = arith.constant 146 : index
    %c0_9 = arith.constant 0 : index
    %9 = vector.load %arg1[%c146, %c0_9] : memref<152x128xf32, #tpu.memory_space<vmem>>, vector<1x96xf32>
    %c147 = arith.constant 147 : index
    %c0_10 = arith.constant 0 : index
    %10 = vector.load %arg1[%c147, %c0_10] : memref<152x128xf32, #tpu.memory_space<vmem>>, vector<1x96xf32>
    %c148 = arith.constant 148 : index
    %c0_11 = arith.constant 0 : index
    %11 = vector.load %arg1[%c148, %c0_11] : memref<152x128xf32, #tpu.memory_space<vmem>>, vector<1x16xf32>
    %c0_12 = arith.constant 0 : index
    %c0_13 = arith.constant 0 : index
    %12 = vector.load %arg1[%c0_12, %c0_13] : memref<152x128xf32, #tpu.memory_space<vmem>>, vector<32x128xf32>
    %cst = arith.constant dense<0.000000e+00> : vector<2x128xf32>
    %13 = tpu.matmul %5, %12, %cst {dimension_numbers = #tpu.dot_dimension_numbers<[1], [0], [0], [1], [0, 0, 1, 1], [], []>} : vector<2x32xf32>, vector<32x128xf32>, vector<2x128xf32> -> vector<2x128xf32>
    %14 = vector.extract_strided_slice %13 {offsets = [0, 0], sizes = [2, 32], strides = [1, 1]} : vector<2x128xf32> to vector<2x32xf32>
    %15 = vector.extract_strided_slice %13 {offsets = [0, 32], sizes = [2, 96], strides = [1, 1]} : vector<2x128xf32> to vector<2x96xf32>
    %16 = vector.broadcast %10 : vector<1x96xf32> to vector<2x96xf32>
    %17 = arith.addf %15, %16 : vector<2x96xf32>
    %c80 = arith.constant 80 : index
    %c0_14 = arith.constant 0 : index
    %18 = vector.load %arg1[%c80, %c0_14] : memref<152x128xf32, #tpu.memory_space<vmem>>, vector<32x32xf32>
    %cst_15 = arith.constant dense<0.000000e+00> : vector<16x32xf32>
    %19 = tpu.matmul %6, %18, %cst_15 {dimension_numbers = #tpu.dot_dimension_numbers<[1], [0], [0], [1], [0, 0, 1, 1], [], []>} : vector<16x32xf32>, vector<32x32xf32>, vector<16x32xf32> -> vector<16x32xf32>
    %20 = vector.shape_cast %6 : vector<16x32xf32> to vector<2x8x32xf32>
    %21 = vector.shape_cast %19 : vector<16x32xf32> to vector<2x8x32xf32>
    %22 = vector.shape_cast %14 : vector<2x32xf32> to vector<2x1x32xf32>
    %23 = vector.broadcast %22 : vector<2x1x32xf32> to vector<2x8x32xf32>
    %24 = arith.addf %21, %23 : vector<2x8x32xf32>
    %25 = vector.shape_cast %7 : vector<1x32xf32> to vector<1x1x32xf32>
    %26 = vector.broadcast %25 : vector<1x1x32xf32> to vector<2x8x32xf32>
    %27 = arith.addf %24, %26 : vector<2x8x32xf32>
    %cst_16 = arith.constant dense<0xFF800000> : vector<8x32xf32>
    %28 = vector.multi_reduction <maximumf>, %27, %cst_16 [0] : vector<2x8x32xf32> to vector<8x32xf32>
    %29 = vector.shape_cast %28 : vector<8x32xf32> to vector<1x8x32xf32>
    %30 = vector.broadcast %29 : vector<1x8x32xf32> to vector<2x8x32xf32>
    %31 = arith.subf %27, %30 : vector<2x8x32xf32>
    %32 = math.exp %31 : vector<2x8x32xf32>
    %cst_17 = arith.constant dense<0.000000e+00> : vector<8x32xf32>
    %33 = vector.multi_reduction <add>, %32, %cst_17 [0] : vector<2x8x32xf32> to vector<8x32xf32>
    %34 = vector.shape_cast %33 : vector<8x32xf32> to vector<1x8x32xf32>
    %35 = tpu.reciprocal %34 {approx = true} : vector<1x8x32xf32> -> vector<1x8x32xf32>
    %36 = vector.broadcast %35 : vector<1x8x32xf32> to vector<2x8x32xf32>
    %37 = arith.mulf %32, %36 : vector<2x8x32xf32>
    %38 = vector.shape_cast %8 : vector<1x32xf32> to vector<1x1x32xf32>
    %39 = vector.broadcast %38 : vector<1x1x32xf32> to vector<2x8x32xf32>
    %40 = arith.mulf %37, %39 : vector<2x8x32xf32>
    %cst_18 = arith.constant dense<0.000000e+00> : vector<2x8xf32>
    %41 = vector.multi_reduction <add>, %40, %cst_18 [2] : vector<2x8x32xf32> to vector<2x8xf32>
    %cst_19 = arith.constant 0.000000e+00 : f32
    %42 = vector.broadcast %cst_19 : f32 to vector<2x8xf32>
    %43 = arith.maximumf %41, %42 : vector<2x8xf32>
    %44 = vector.shape_cast %43 : vector<2x8xf32> to vector<2x8x1xf32>
    %45 = vector.broadcast %44 : vector<2x8x1xf32> to vector<2x8x32xf32>
    %46 = arith.mulf %45, %20 : vector<2x8x32xf32>
    %cst_20 = arith.constant dense<0.000000e+00> : vector<2x32xf32>
    %47 = vector.multi_reduction <add>, %46, %cst_20 [1] : vector<2x8x32xf32> to vector<2x32xf32>
    %c64 = arith.constant 64 : index
    %c0_21 = arith.constant 0 : index
    %48 = vector.load %arg1[%c64, %c0_21] : memref<152x128xf32, #tpu.memory_space<vmem>>, vector<16x96xf32>
    %cst_22 = arith.constant dense<0.000000e+00> : vector<2x96xf32>
    %49 = tpu.matmul %4, %48, %cst_22 {dimension_numbers = #tpu.dot_dimension_numbers<[1], [0], [0], [1], [0, 0, 1, 1], [], []>} : vector<2x16xf32>, vector<16x96xf32>, vector<2x96xf32> -> vector<2x96xf32>
    %c32 = arith.constant 32 : index
    %c0_23 = arith.constant 0 : index
    %50 = vector.load %arg1[%c32, %c0_23] : memref<152x128xf32, #tpu.memory_space<vmem>>, vector<32x112xf32>
    %cst_24 = arith.constant dense<0.000000e+00> : vector<2x112xf32>
    %51 = tpu.matmul %47, %50, %cst_24 {dimension_numbers = #tpu.dot_dimension_numbers<[1], [0], [0], [1], [0, 0, 1, 1], [], []>} : vector<2x32xf32>, vector<32x112xf32>, vector<2x112xf32> -> vector<2x112xf32>
    %52 = vector.extract_strided_slice %51 {offsets = [0, 0], sizes = [2, 96], strides = [1, 1]} : vector<2x112xf32> to vector<2x96xf32>
    %53 = arith.addf %49, %52 : vector<2x96xf32>
    %54 = vector.broadcast %9 : vector<1x96xf32> to vector<2x96xf32>
    %55 = arith.addf %53, %54 : vector<2x96xf32>
    %56 = vector.extract_strided_slice %55 {offsets = [0, 0], sizes = [2, 32], strides = [1, 1]} : vector<2x96xf32> to vector<2x32xf32>
    %57 = vector.extract_strided_slice %17 {offsets = [0, 0], sizes = [2, 32], strides = [1, 1]} : vector<2x96xf32> to vector<2x32xf32>
    %58 = arith.addf %56, %57 : vector<2x32xf32>
    %59 = arith.negf %58 : vector<2x32xf32>
    %60 = math.exp %59 : vector<2x32xf32>
    %cst_25 = arith.constant 1.000000e+00 : f32
    %61 = vector.broadcast %cst_25 : f32 to vector<2x32xf32>
    %62 = arith.addf %61, %60 : vector<2x32xf32>
    %63 = arith.divf %61, %62 : vector<2x32xf32>
    %64 = vector.extract_strided_slice %55 {offsets = [0, 32], sizes = [2, 32], strides = [1, 1]} : vector<2x96xf32> to vector<2x32xf32>
    %65 = vector.extract_strided_slice %17 {offsets = [0, 32], sizes = [2, 32], strides = [1, 1]} : vector<2x96xf32> to vector<2x32xf32>
    %66 = arith.addf %64, %65 : vector<2x32xf32>
    %67 = arith.negf %66 : vector<2x32xf32>
    %68 = math.exp %67 : vector<2x32xf32>
    %cst_26 = arith.constant 1.000000e+00 : f32
    %69 = vector.broadcast %cst_26 : f32 to vector<2x32xf32>
    %70 = arith.addf %69, %68 : vector<2x32xf32>
    %71 = arith.divf %69, %70 : vector<2x32xf32>
    %72 = vector.extract_strided_slice %55 {offsets = [0, 64], sizes = [2, 32], strides = [1, 1]} : vector<2x96xf32> to vector<2x32xf32>
    %73 = vector.extract_strided_slice %17 {offsets = [0, 64], sizes = [2, 32], strides = [1, 1]} : vector<2x96xf32> to vector<2x32xf32>
    %74 = arith.mulf %63, %73 : vector<2x32xf32>
    %75 = arith.addf %72, %74 : vector<2x32xf32>
    %76 = math.tanh %75 : vector<2x32xf32>
    %cst_27 = arith.constant 1.000000e+00 : f32
    %77 = vector.broadcast %cst_27 : f32 to vector<2x32xf32>
    %78 = arith.subf %77, %71 : vector<2x32xf32>
    %79 = arith.mulf %78, %76 : vector<2x32xf32>
    %80 = arith.mulf %71, %5 : vector<2x32xf32>
    %81 = arith.addf %79, %80 : vector<2x32xf32>
    %c112 = arith.constant 112 : index
    %c0_28 = arith.constant 0 : index
    %82 = vector.load %arg1[%c112, %c0_28] : memref<152x128xf32, #tpu.memory_space<vmem>>, vector<32x16xf32>
    %cst_29 = arith.constant dense<0.000000e+00> : vector<2x16xf32>
    %83 = tpu.matmul %81, %82, %cst_29 {dimension_numbers = #tpu.dot_dimension_numbers<[1], [0], [0], [1], [0, 0, 1, 1], [], []>} : vector<2x32xf32>, vector<32x16xf32>, vector<2x16xf32> -> vector<2x16xf32>
    %84 = vector.extract_strided_slice %51 {offsets = [0, 96], sizes = [2, 16], strides = [1, 1]} : vector<2x112xf32> to vector<2x16xf32>
    %85 = arith.addf %83, %84 : vector<2x16xf32>
    %86 = vector.broadcast %11 : vector<1x16xf32> to vector<2x16xf32>
    %87 = arith.addf %85, %86 : vector<2x16xf32>
    %c0_30 = arith.constant 0 : index
    %c0_31 = arith.constant 0 : index
    %88 = vector.load %arg6[%c0_30, %c0_31] : memref<2x32xf32, #tpu.memory_space<vmem>>, vector<2x32xf32>
    tpu.vector_store %arg6[%c0_30, %c0_31], %81 {strides = array<i32>} : memref<2x32xf32, #tpu.memory_space<vmem>>, vector<2x32xf32>,
    %89 = vector.shape_cast %87 : vector<2x16xf32> to vector<1x2x16xf32>
    %c0_32 = arith.constant 0 : index
    %c0_33 = arith.constant 0 : index
    %c0_34 = arith.constant 0 : index
    %90 = vector.load %arg5[%c0_32, %c0_33, %c0_34] : memref<1x2x128xf32, #tpu.memory_space<vmem>>, vector<1x2x16xf32>
    tpu.vector_store %arg5[%c0_32, %c0_33, %c0_34], %89 {strides = array<i32>} : memref<1x2x128xf32, #tpu.memory_space<vmem>>, vector<1x2x16xf32>,
    %91 = vector.shape_cast %81 : vector<2x32xf32> to vector<1x2x32xf32>
    %c0_35 = arith.constant 0 : index
    %c0_36 = arith.constant 0 : index
    %c16 = arith.constant 16 : index
    %92 = vector.load %arg5[%c0_35, %c0_36, %c16] : memref<1x2x128xf32, #tpu.memory_space<vmem>>, vector<1x2x32xf32>
    tpu.vector_store %arg5[%c0_35, %c0_36, %c16], %91 {strides = array<i32>} : memref<1x2x128xf32, #tpu.memory_space<vmem>>, vector<1x2x32xf32>,
    %93 = vector.shape_cast %43 : vector<2x8xf32> to vector<1x2x8xf32>
    %c0_37 = arith.constant 0 : index
    %c0_38 = arith.constant 0 : index
    %c48 = arith.constant 48 : index
    %94 = vector.load %arg5[%c0_37, %c0_38, %c48] : memref<1x2x128xf32, #tpu.memory_space<vmem>>, vector<1x2x8xf32>
    tpu.vector_store %arg5[%c0_37, %c0_38, %c48], %93 {strides = array<i32>} : memref<1x2x128xf32, #tpu.memory_space<vmem>>, vector<1x2x8xf32>,
    %cst_39 = arith.constant 0.000000e+00 : f32
    %95 = vector.broadcast %cst_39 : f32 to vector<1x2x72xf32>
    %c0_40 = arith.constant 0 : index
    %c0_41 = arith.constant 0 : index
    %c56 = arith.constant 56 : index
    %96 = vector.load %arg5[%c0_40, %c0_41, %c56] : memref<1x2x128xf32, #tpu.memory_space<vmem>>, vector<1x2x72xf32>
    tpu.vector_store %arg5[%c0_40, %c0_41, %c56], %95 {strides = array<i32>} : memref<1x2x128xf32, #tpu.memory_space<vmem>>, vector<1x2x72xf32>,
    return
  }
  func.func @transform_0(%arg0: i32) -> (i32, i32) {
    %c0_i32 = arith.constant 0 : i32
    %c0_i32_0 = arith.constant 0 : i32
    %c0_i32_1 = arith.constant 0 : i32
    return %c0_i32, %c0_i32_0 : i32, i32
  }
  func.func @transform_1(%arg0: i32) -> (i32, i32) {
    %c0_i32 = arith.constant 0 : i32
    %c0_i32_0 = arith.constant 0 : i32
    %c0_i32_1 = arith.constant 0 : i32
    return %c0_i32, %c0_i32_0 : i32, i32
  }
  func.func @transform_2(%arg0: i32) -> (i32, i32) {
    %c0_i32 = arith.constant 0 : i32
    %c0_i32_0 = arith.constant 0 : i32
    %c0_i32_1 = arith.constant 0 : i32
    return %c0_i32, %c0_i32_0 : i32, i32
  }
  func.func @transform_3(%arg0: i32) -> (i32, i32, i32) {
    %c0_i32 = arith.constant 0 : i32
    %c0_i32_0 = arith.constant 0 : i32
    %c0_i32_1 = arith.constant 0 : i32
    return %arg0, %c0_i32, %c0_i32_0 : i32, i32, i32
  }
  func.func @transform_4(%arg0: i32) -> (i32, i32, i32) {
    %c0_i32 = arith.constant 0 : i32
    %c0_i32_0 = arith.constant 0 : i32
    %c0_i32_1 = arith.constant 0 : i32
    return %arg0, %c0_i32, %c0_i32_0 : i32, i32, i32
  }
}

</mosaic_0001>

<bundles_post_ra>
// kernel: _decode_steps.1
= control target key start
LH: loop header
LB: loop body
LE: loop exit
PB: predicated region body
PF: predicated region fallthrough
CT: control target
= control target key end

     0   :  { %9 = vsyncpa [#allocation4], 0  ;;  %s1544_s0 = inlined_call_operand.hbm [shape: f32[152,128], index: 0, kind: input, shape index: {}]   ;;  %s1545_s1 = inlined_call_operand.vmem [shape: f32[2,32], index: 1, kind: input, shape index: {}]   ;;  %s1546_s2 = inlined_call_operand.hbm [shape: f32[16,32], index: 2, kind: input, shape index: {}]   ;;  %s1547_s3 = inlined_call_operand.hbm [shape: f32[5,2,16], index: 3, kind: input, shape index: {}]   ;;  %s1548_s4 = inlined_call_operand.vmem [shape: f32[5,2,128], index: 4, kind: output, shape index: {}]  }
   0x1   :  { %10 = vsyncpa [#allocation6], 0  ;;  %s1289_s15 = smov 0   ;;  %s1291_s16 = smov 0  }
   0x2   :  { %s1293_s17 = smov 0   ;;  %s1295_s18 = smov 0  }
   0x3 LB: > { %s1308_s19 = sadd.s32 4294967295, %s1249_s18   ;;  %p99_p0 = scmp.ne.s32.totalorder %s1241_s16, %s1237_s15  ;;  %s1249_s18 = sphi %s1295_s18, %s1566_s18   ;;  %s1245_s17 = sphi %s1293_s17, %s1565_s17   ;;  %s1241_s16 = sphi %s1291_s16, %s1564_s16   ;;  %s1237_s15 = sphi %s1289_s15, %s1563_s15  }
   0x4   : > { %p1549_p1 = scmp.eq.s32.totalorder %s1308_s19, 0  ;;  %p909_p2 = scmp.ge.s32.totalorder %s1249_s18, 1 }
   0x5   : > { %p136_p3 = scmp.lt.s32.totalorder %s1249_s18, 6  ;;  %s1251_s22 = smov [#allocation3]  }
   0x6   : > { %p1317_p5 = por %p1549_p1, %p99_p0  ;;  %s148_s23 = sshll.u32 %s1251_s22, 4  ;;  %s149_s23 = int_to_ptr.vmem [resolvable:$true] %s148_s23 }
   0x7   : > { %p1321_p6 = pnand %p909_p2, %p136_p3  ;;  %s1252_s25 = smov [#allocation5]  }
   0x8   : > { %s1552_s20 = scalar_select %p1317_p5, 1, 0 }
   0x9   : > { %s1553_s21 = scalar_select %p1321_p6, 1, 0 }
   0xa   : > { %p1049_p7 = pneg %p1321_p6  ;;  %s164_s26 = sshll.u32 %s1252_s25, 4  ;;  %s1333_s26 = int_to_ptr.vmem [resolvable:$true] %s164_s26 }
   0xb   : > { %s1121_s29 = scalar_lea.hbm %s1544_s0, 2432 }
   0xc   : > { %p1329_p8 = pnand %p1049_p7, %p1549_p1  ;;  %p1122_p9 = scmp.ne.s32.totalorder %s1544_s0, %s1121_s29 }
   0xd   : > { %p1128_p13 = scmp.lt.u32.totalorder %s1121_s29, %s1544_s0 }
   0xe   : > { %p1123_p10 = pneg %p1329_p8 }
  0x10   : > { %p1124_p11 = pnand %p1123_p10, %p1122_p9 }
  0x12   : > { %p1125_p12 = pneg %p1124_p11 }
  0x14   : > { %p1130_p0 = pnand %p1128_p13, %p1125_p12 }
  0x16   : > { %1133 = shalt.err (!%p1130_p0)
}
  0x17   : > { %s1134_s8 = scalar_lea.vmem %s149_s23, 2432  ;;  %p1142_p4 = scmp.lt.s32.totalorder %s149_s23, %s149_s23 }
  0x18   : > { %p1135_p2 = scmp.ne.s32.totalorder %s149_s23, %s1134_s8  ;;  %p1143_p1 = scmp.lt.s32.totalorder %s1134_s8, %s1134_s8 }
  0x1a   : > { %p1137_p3 = pnand %p1135_p2, %p1123_p10  ;;  %p1144_p5 = por %p1143_p1, %p1142_p4 }
  0x1c   : > { %p1138_p7 = pneg %p1137_p3 }
  0x1e   : > { %p1145_p6 = pnand %p1144_p5, %p1138_p7 }
  0x20   : > { %1148 = shalt.err (!%p1145_p6)
}
  0x21   : > { %s1253_s9 = smov 128   ;;  %s1254_s10 = smov 8  }
  0x22   : > { %1052 = dma.hbm_to_vmem [thread:$0]  (!%p1329_p8), %s1544_s0, 2432, %s149_s23, [#allocation4], %s1253_s9, %s1253_s9, %s1254_s10  }
  0x23   : > { %s1149_s15 = scalar_lea.hbm %s1546_s2, 256 }
  0x24   : > { %p1150_p9 = scmp.ne.s32.totalorder %s1546_s2, %s1149_s15  ;;  %p1156_p5 = scmp.lt.u32.totalorder %s1149_s15, %s1546_s2 }
  0x26   : > { %p1152_p1 = pnand %p1150_p9, %p1123_p10 }
  0x28   : > { %p1153_p4 = pneg %p1152_p1 }
  0x2a   : > { %p1158_p6 = pnand %p1156_p5, %p1153_p4 }
  0x2c   : > { %1161 = shalt.err (!%p1158_p6)
}
  0x2d   : > { %s1162_s23 = scalar_lea.vmem %s1333_s26, 256  ;;  %p1170_p0 = scmp.lt.s32.totalorder %s1333_s26, %s1333_s26 }
  0x2e   : > { %p1163_p11 = scmp.ne.s32.totalorder %s1333_s26, %s1162_s23  ;;  %p1171_p2 = scmp.lt.s32.totalorder %s1162_s23, %s1162_s23 }
  0x30   : > { %p1165_p12 = pnand %p1163_p11, %p1123_p10  ;;  %p1172_p3 = por %p1171_p2, %p1170_p0 }
  0x32   : > { %p1166_p13 = pneg %p1165_p12 }
  0x34   : > { %p1173_p7 = pnand %p1172_p3, %p1166_p13 }
  0x36   : > { %1176 = shalt.err (!%p1173_p7)
}
  0x37   : > { %1055 = dma.hbm_to_vmem [thread:$0]  (!%p1329_p8), %s1546_s2, 256, %s1333_s26, [#allocation6], %s1253_s9, %s1253_s9, %s1254_s10  }
  0x38   : > { %s1383_s5 = sadd.s32 1, %s1249_s18   ;;  %s86_s24 = sadd.s32 1, %s1245_s17 }
  0x39   : > { %s83_s6 = ssub.s32 %s1249_s18, %s1383_s5  ;;  %p93_p10 = scmp.ne.s32.totalorder %s1245_s17, %s1241_s16 }
  0x3a   : > { %p84_p9 = scmp.eq.s32.totalorder %s83_s6, 0  ;;  %p94_p1 = scmp.eq.s32.totalorder %s1249_s18, 0 }
  0x3b   : > { %p1062_p4 = scmp.lt.s32.totalorder %s1249_s18, 5  ;;  %s178_s7 = sand.u32 1, %s1249_s18  }
  0x3c   : > { %s1394_s8 = scalar_select %p84_p9, %s1245_s17, %s86_s24  }
  0x3d   : > { %p95_p5 = por %p94_p1, %p93_p10  ;;  %s180_s11 = sand.u32 1, %s1245_s17  }
  0x3e   : > { %s914_s12 = sshll.u32 %s1249_s18, 5  ;;  %s913_s13 = sshll.u32 %s180_s11, 1 }
  0x3f   : > { %s1401_s26 = scalar_lea.hbm %s1547_s3, %s914_s12  ;;  %p1403_p8 = pnand %p1062_p4, %p95_p5 }
  0x40   : > { %s182_s10 = scalar_lea.vmem [#allocation7], %s913_s13  ;;  %s179_s18 = scalar_lea.sflag [#allocation4], %s178_s7 }
  0x41   : > { %s189_s22 = sshll.u32 %s182_s10, 4  ;;  %s1177_s25 = scalar_lea.hbm %s1401_s26, 32  ;;  %s1407_s22 = int_to_ptr.vmem [resolvable:$true] %s189_s22 }
  0x42   : > { %p1178_p6 = scmp.ne.s32.totalorder %s1401_s26, %s1177_s25  ;;  %p1179_p11 = pneg %p1403_p8 }
  0x43   : > { %s1182_s23 = scalar_lea.hbm %s1547_s3, 160  ;;  %p1183_p0 = scmp.lt.u32.totalorder %s1401_s26, %s1547_s3 }
  0x44   : > { %p1180_p12 = pnand %p1179_p11, %p1178_p6  ;;  %p1184_p2 = scmp.lt.u32.totalorder %s1182_s23, %s1177_s25 }
  0x45   : > { %p1186_p7 = scmp.lt.u32.totalorder %s1177_s25, %s1401_s26 }
  0x46   : > { %p1181_p13 = pneg %p1180_p12  ;;  %p1185_p3 = por %p1184_p2, %p1183_p0 }
  0x48   : > { %p1187_p10 = por %p1186_p7, %p1185_p3 }
  0x4a   : > { %p1188_p9 = pnand %p1187_p10, %p1181_p13 }
  0x4c   : > { %1191 = shalt.err (!%p1188_p9)
}
  0x4d   : > { %s1192_s24 = scalar_lea.vmem %s1407_s22, 32  ;;  %s1255_s6 = smov [#allocation7]  }
  0x4e   : > { %p1193_p1 = scmp.ne.s32.totalorder %s1407_s22, %s1192_s24  ;;  %s1197_s7 = sshll.u32 %s1255_s6, 4  ;;  %s1198_s7 = int_to_ptr.vmem [resolvable:$false] %s1197_s7 }
  0x4f   : > { %s1199_s11 = scalar_lea.vmem %s1198_s7, 64  ;;  %p1200_p6 = scmp.lt.s32.totalorder %s1407_s22, %s1198_s7 }
  0x50   : > { %p1195_p4 = pnand %p1193_p1, %p1179_p11  ;;  %p1201_p12 = scmp.lt.s32.totalorder %s1199_s11, %s1192_s24 }
  0x52   : > { %p1196_p5 = pneg %p1195_p4  ;;  %p1202_p0 = por %p1201_p12, %p1200_p6 }
  0x54   : > { %p1203_p2 = pnand %p1202_p0, %p1196_p5 }
  0x56   : > { %1206 = shalt.err (!%p1203_p2)
}
  0x57   : > { %1059 = dma.hbm_to_vmem [thread:$0]  (!%p1403_p8), %s1401_s26, 32, %s1407_s22, %s179_s18  }
  0x58   : > { %p1556_p13 = scmp.ne.s32.totalorder %s1553_s21, 0 }
  0x59   : > { %p1557_p11 = scmp.eq.s32.totalorder (!%p1556_p13), %s1308_s19, 0 }
  0x5a   : > { %198 = sbr.rel (%p1556_p13) target bundleno = 1385 (0x569), region = 36 }
  0x61   : > { %1224 = dma.done.wait (%p1557_p11), [#allocation4], 2432   ;;  %p1558_p3 = pmov %p1557_p11 }
  0x63   : > { %1226 = vsyncadd (%p1558_p3), [#allocation4], 4294964864  ;;  %p1559_p7 = pmov %p1558_p3 }
  0x64   : > { %p1560_p10 = pmov %p1558_p3 }
  0x65   : > { %1228 = dma.done.wait (%p1559_p7), [#allocation6], 256  }
  0x66   : > { %1230 = vsyncadd (%p1560_p10), [#allocation6], 4294967040  ;;  %s208_s12 = sand.u32 1, %s1308_s19   ;;  %s210_s13 = sand.u32 1, %s1241_s16  }
  0x67   : > { %s1446_s14 = sshll.u32 %s210_s13, 1  ;;  %s209_s21 = scalar_lea.sflag [#allocation4], %s208_s12 }
  0x68   : > { %s212_s15 = scalar_lea.vmem [#allocation7], %s1446_s14  ;;  %p1561_p8 = scmp.ne.s32.totalorder %s1552_s20, 0 }
  0x6a   : > { %1232 = dma.done.wait (%p1561_p8), %s209_s21, 32  }
  0x6b   : > { %1234 = vsyncadd (%p1561_p8), %s209_s21, 4294967264  ;;  %p236_p9 = scmp.lt.s32.totalorder %s1308_s19, 4  ;;  %p1562_p1 = scmp.ne.s32.totalorder %s1308_s19, 0 }
  0x6c   : > { %v244_v0 = vld [vmem:[%s1545_s1] sm:$0x3] (!%p1562_p1)  ;;  %vm245_vm0 = vcmask (!%p1562_p1), 254976  }
  0x6d   : > { %s237_s26 = scalar_select %p236_p9, %s1308_s19, 4 }
  0x6e   : > { %243 = sbr.rel (%p1562_p1) target bundleno = 117 (0x75), region = 52  ;;  %246 = vst.msk [vmem:[#allocation2] sm:$0x3] (!%p1562_p1), %vm245_vm0, %v244_v0 }
  0x6f   : > { %s919_s9 = sshll.u32 %s237_s26, 1 }
  0x70   : > { %s1458_s18 = scalar_lea.vmem %s1548_s4, %s919_s9 }
  0x75 PF: > { %v256_v1 = vld [vmem:[#allocation3] sm:$0xff]  ;;  %v257_v2 = vld [vmem:[#allocation3 + $0x8] sm:$0xff]  ;;  %v258_v3 = vld [vmem:[#allocation3 + $0x10] sm:$0xff]  ;;  %v1256_v4 = vmov 0.0|0.0   ;;  %vm1257_vm1 = vmmov 0   ;;  %v1258_v9 = vmov 0.0   ;;  %v432_v21 = vlaneseq }
  0x76   : > { %1010 = vmatprep.subr.bf16.mxu0 %v1256_v4  ;;  %v1011_v5 = vpack.c.bf16 %v257_v2, %v256_v1  ;;  %v259_v6 = vld [vmem:[#allocation3 + $0x18] sm:$0xff]  ;;  %v343_v7 = vld [vmem:[#allocation3 + $0x50] sm:$0xff]  ;;  %967 = vmatprep.mubr.msk.f32.mxu0 %vm1257_vm1, %v1258_v9  ;;  %v345_v11 = vld [vmem:[#allocation3 + $0x60] sm:$0xff]  ;;  %vm260_vm2 = vcmask 261120   ;;  %s1259_s19 = smov 32   ;;  %s1261_s20 = smov 96  }
  0x77   : > { %v344_v8 = vld [vmem:[#allocation3 + $0x58] sm:$0xff]  ;;  %v346_v12 = vld [vmem:[#allocation3 + $0x68] sm:$0xff]  ;;  %v1014_v13 = vpack.c.bf16 %v259_v6, %v258_v3  ;;  %v922_v16 = vld [vmem:[#allocation3 + $0x93] ss:$0 sm:$0xff]  ;;  %v1260_v19 = vmov 1966171168  }
  0x78   : > { %v1016_v10 = vpack.c.bf16 %v344_v8, %v343_v7  ;;  %1012 = vmatpush3.bf16.msra.mxu0 %v1011_v5  ;;  %v1020_v14 = vpack.c.bf16 %v346_v12, %v345_v11  ;;  %v1468_v15 = vld [vmem:[#allocation5] sm:$0xff]  ;;  %339 = vrot.lane.b32.xlu1 %v922_v16, %s1259_s19  ;;  %v1477_v18 = vld [vmem:[#allocation5 + $0x8] sm:$0xff]  ;;  %v430_v20 = vunpack.c.l.s4 %v1260_v19  ;;  %v1489_v23 = vshrl.u32 %v432_v21, 7  ;;  %v925_v37 = vld [vmem:[#allocation3 + $0x90] ss:$0 sm:$0xff]  ;;  %s1262_s28 = smov 64  }
  0x79   : > { %1013 = vmatprep.subr.bf16.mxu0 %v1256_v4  ;;  %978 = vmatprep.mubr.msk.f32.mxu1 %vm260_vm2, %v1468_v15  ;;  %v1474_v17 = vld [vmem:[#allocation2] sm:$0x3]  ;;  %v926_v56 = vld [vmem:[#allocation3 + $0x91] ss:$0 sm:$0xff]  ;;  %v516_v63 = vld [vmem:[#allocation3 + $0x20] sm:$0xff]  ;;  %vm596_vm3 = vcmask 130048  }
  0x7a   : > { %1017 = vmatprep.subr.bf16.mxu1 %v1016_v10  ;;  %v431_v22 = vunpack.c.0.s8 %v430_v20  ;;  %v453_v30 = vsub.s32 0, %v1489_v23  ;;  %v517_v0 = vld [vmem:[#allocation3 + $0x28] sm:$0xff]  ;;  %v514_v2 = vld [vmem:[#allocation3 + $0x40] sm:$0xff]  ;;  %v518_v6 = vld [vmem:[#allocation3 + $0x30] sm:$0xff]  ;;  %v808_v11 = vand.u32 127, %v432_v21  ;;  %vm522_vm4 = vcmask 1041409  }
  0x7b   : > { %1019 = vmatpush3.bf16.msra.mxu1 %v1016_v10  ;;  %v1025_v1 = vpack.c.bf16 %v517_v0, %v516_v63  ;;  %v515_v3 = vld [vmem:[#allocation3 + $0x48] sm:$0xff]  ;;  %v519_v7 = vld [vmem:[#allocation3 + $0x38] sm:$0xff]  ;;  %s1263_s23 = smov 112   ;;  %vm796_vm5 = vcmask 254976   ;;  %vm798_vm6 = vcmask 123904   ;;  %vm803_vm7 = vcmask 386176  }
  0x7c   : > { %1021 = vmatprep.subr.bf16.mxu1 %v1020_v14  ;;  %1015 = vmatpush3.bf16.msra.mxu0 %v1014_v13  ;;  %v434_v24 = vsub.s32 %v431_v22, %v1489_v23  ;;  %v1031_v5 = vpack.c.bf16 %v515_v3, %v514_v2  ;;  %v1028_v8 = vpack.c.bf16 %v519_v7, %v518_v6  ;;  %v247_v10 = vld [vmem:[%s212_s15] sm:$0x3]  ;;  %v809_v12 = vadd.s32 4294967248, %v808_v11  ;;  %v932_v6 = vld [vmem:[#allocation3 + $0x94] ss:$0 sm:$0xff] }
  0x7d   : > { %1024 = vmatprep.subr.bf16.mxu0 %v1256_v4  ;;  %vm820_vm8 = vcmask 451968   ;;  %vm822_vm9 = vcmask 1041856  }
  0x7e   : > { %v812_v16 = vsub.s32 %v809_v12, %v1489_v23 }
  0x7f   : > { %1023 = vmatpush3.bf16.msra.mxu1 %v1020_v14  ;;  %968 = vmatmul.mubr.msk.f32.vlgmr.msra.gmra.mrb[0].mxu0 %vm260_vm2, %v1474_v17 }
  0x80   : > { %1030 = vmatprep.subr.bf16.mxu1 %v1256_v4  ;;  %989 = vmatprep.mubr.msk.f32.mxu0 %vm1257_vm1, %v1258_v9 }
  0x81   : > { %1026 = vmatpush3.bf16.msra.mxu0 %v1025_v1 }
  0x82   : > { %979 = vmatmul.mubr.msk.f32.vlgmr.msra.gmra.mrb[0].mxu1 %vm260_vm2, %v1477_v18  ;;  %1027 = vmatprep.subr.bf16.mxu0 %v1256_v4 }
  0x83   : > { %996 = vmatprep.mubr.msk.f32.mxu1 %vm1257_vm1, %v1258_v9  ;;  %1032 = vmatpush3.bf16.msra.mxu1 %v1031_v5 }
  0x84   : > { %1033 = vmatprep.subr.bf16.mxu1 %v1256_v4 }
  0x85   : > { %1029 = vmatpush3.bf16.msra.mxu0 %v1028_v8 }
  0x86   : > { %997 = vmatmul.mubr.msk.f32.vlgmr.msra.gmra.mrb[2].mxu1 %vm596_vm3, %v247_v10 }
  0x87   : > { %1007 = vmatprep.mubr.msk.f32.mxu1 %vm1257_vm1, %v1258_v9 }
  0xea   : > { %v340_v25 = vpop.permute.xlu1 %339 }
 0x152   : > { %v330_v26 = vpop.f32.mrb[0].mxu0 }
 0x153   : > { %v342_v27 = vadd.f32 %v340_v25, %v330_v26  ;;  %v435_v28 = vrot.slane %v330_v26, %v434_v24  ;;  %v969_v29 = vpop.f32.mrb[1].mxu0 }
 0x155   : > { %v980_v31 = vpop.f32.mrb[0].mxu1  ;;  %v436_v32 = vcombine.high %v435_v28, %v435_v28  ;;  %v443_v33 = vrot.slane %v435_v28, %v434_v24  ;;  %676 = vrot.lane.b32.xlu1 %v342_v27, %s1261_s20 }
 0x156   : > { %v419_v34 = vpop.f32.mrb[1].mxu1 }
 0x157   : > { %v450_v35 = vrot.slane %v436_v32, %v434_v24  ;;  %v454_v36 = vrot.slane %v443_v33, %v453_v30 }
 0x159   : > { %v458_v38 = vrot.slane %v450_v35, %v453_v30  ;;  %v461_v39 = vadd.f32 %v454_v36, %v419_v34 }
 0x15b   : > { %v462_v40 = vadd.f32 %v980_v31, %v458_v38  ;;  %v467_v41 = vadd.f32 %v925_v37, %v461_v39 }
 0x15d   : > { %v468_v42 = vadd.f32 %v925_v37, %v462_v40  ;;  %v469_v44 = vsel %vm260_vm2, %v467_v41, -inf }
 0x15f   : > { %v470_v43 = vsel %vm260_vm2, %v468_v42, -inf }
 0x160   : > { %v471_v45 = vmax.f32 %v469_v44, %v470_v43 }
 0x162   : > { %v472_v46 = vsub.f32 %v467_v41, %v471_v45  ;;  %v473_v47 = vsub.f32 %v468_v42, %v471_v45  ;;  %v929_v41 = vld [vmem:[#allocation3 + $0x92] ss:$0 sm:$0xff] }
 0x164   : > { %v474_v48 = vmul.f32 1.442695, %v472_v46  ;;  %v476_v49 = vmul.f32 1.442695, %v473_v47 }
 0x166   : > { %1109 = vpow2.f32 %v474_v48 }
 0x167   : > { %1111 = vpow2.f32 %v476_v49 }
 0x170   : > { %v1110_v50 = vpop.eup %1109 }
 0x171   : > { %v1112_v51 = vpop.eup %1111  ;;  %v478_v52 = vsel %vm260_vm2, %v1110_v50, 0.0 }
 0x172   : > { %v479_v53 = vsel %vm260_vm2, %v1112_v51, 0.0 }
 0x173   : > { %v480_v54 = vadd.f32 %v479_v53, %v478_v52 }
 0x175   : > { %1113 = vrcp.f32 %v480_v54 }
 0x17f   : > { %v1114_v55 = vpop.eup %1113 }
 0x180   : > { %v482_v57 = vmul.f32 %v1114_v55, %v1110_v50  ;;  %v483_v58 = vmul.f32 %v1114_v55, %v1112_v51 }
 0x182   : > { %v488_v59 = vmul.f32 %v926_v56, %v482_v57  ;;  %v489_v61 = vmul.f32 %v926_v56, %v483_v58  ;;  %v707_v57 = vld [vmem:[#allocation3 + $0x70] sm:$0xff]  ;;  %v708_v58 = vld [vmem:[#allocation3 + $0x78] sm:$0xff] }
 0x184   : > { %v490_v60 = vsel %vm260_vm2, %v488_v59, 0.0  ;;  %v493_v62 = vsel %vm260_vm2, %v489_v61, 0.0  ;;  %v709_v59 = vld [vmem:[#allocation3 + $0x80] sm:$0xff]  ;;  %v710_v61 = vld [vmem:[#allocation3 + $0x88] sm:$0xff] }
 0x185   : > { %491 = vadd.xlane.f32.xlu0 %v490_v60  ;;  %v1034_v60 = vpack.c.bf16 %v708_v58, %v707_v57 }
 0x187   : > { %1035 = vmatpush3.bf16.msra.mxu1 %v1034_v60 }
 0x188   : > { %1036 = vmatprep.subr.bf16.mxu1 %v1256_v4 }
 0x189   : > { %494 = vadd.xlane.f32.xlu0 %v493_v62  ;;  %v1037_v62 = vpack.c.bf16 %v710_v61, %v709_v59 }
 0x18b   : > { %1038 = vmatpush3.bf16.msra.mxu1 %v1037_v62 }
 0x19f   : > { %686 = vrot.lane.b32.xlu0 %v342_v27, %s1259_s19 }
 0x1c7   : > { %v677_v46 = vpop.permute.xlu1 %676 }
 0x212   : > { %v492_v13 = vpop.xlane.xlu0 %491 }
 0x213   : > { %v496_v14 = vmax.f32 %v492_v13, 0.0 }
 0x215   : > { %v498_v19 = vmul.f32 %v496_v14, %v1468_v15  ;;  %v813_v26 = vrot.slane %v496_v14, %v812_v16 }
 0x216   : > { %v495_v20 = vpop.xlane.xlu0 %494 }
 0x217   : > { %v500_v22 = vsel %vm260_vm2, %v498_v19, 0.0  ;;  %v497_v24 = vmax.f32 %v495_v20, 0.0 }
 0x218   : > { %v501_v25 = vrot.slane %v500_v22, 4 }
 0x219   : > { %v499_v27 = vmul.f32 %v497_v24, %v1477_v18  ;;  %v817_v28 = vrot.slane %v497_v24, %v812_v16  ;;  %v666_v18 = vpop.f32.mrb[2].mxu1 }
 0x21a   : > { %v502_v29 = vadd.f32 %v501_v25, %v500_v22  ;;  %v998_v40 = vpop.f32.mrb[3].mxu1  ;;  %v687_v52 = vpop.permute.xlu0 %686 }
 0x21b   : > { %v507_v21 = vsel %vm260_vm2, %v499_v27, 0.0  ;;  %v1514_v30 = vsel %vm522_vm4, %v817_v28, %v813_v26 }
 0x21c   : > { %v503_v31 = vrot.slane %v502_v29, 2  ;;  %v508_v23 = vrot.slane %v507_v21, 4 }
 0x21e   : > { %v504_v32 = vadd.f32 %v503_v31, %v502_v29  ;;  %v509_v15 = vadd.f32 %v508_v23, %v507_v21 }
 0x220   : > { %v510_v33 = vrot.slane %v509_v15, 2  ;;  %v505_v34 = vrot.slane %v504_v32, 1 }
 0x222   : > { %v511_v35 = vadd.f32 %v510_v33, %v509_v15  ;;  %v506_v37 = vadd.f32 %v505_v34, %v504_v32 }
 0x224   : > { %v512_v36 = vrot.slane %v511_v35, 1 }
 0x226   : > { %v513_v38 = vadd.f32 %v512_v36, %v511_v35 }
 0x228   : > { %v523_v39 = vsel %vm522_vm4, %v513_v38, %v506_v37 }
 0x229   : > { %990 = vmatmul.mubr.msk.f32.vlgmr.msra.gmra.mrb[2].mxu0 %vm260_vm2, %v523_v39 }
 0x2fc   : > { %v592_v42 = vpop.f32.mrb[2].mxu0 }
 0x2fd   : > { %v667_v43 = vadd.f32 %v666_v18, %v592_v42  ;;  %v991_v44 = vpop.f32.mrb[3].mxu0 }
 0x2ff   : > { %v674_v45 = vadd.f32 %v929_v41, %v667_v43 }
 0x301   : > { %v679_v47 = vadd.f32 %v677_v46, %v674_v45 }
 0x303   : > { %v930_v48 = vmul.f32 -1.442695, %v679_v47 }
 0x305   : > { %1115 = vpow2.f32 %v930_v48 }
 0x30f   : > { %v1116_v49 = vpop.eup %1115 }
 0x310   : > { %v683_v50 = vadd.f32 1.0, %v1116_v49 }
 0x312   : > { %1117 = vrcp.f32 %v683_v50 }
 0x31c   : > { %v1118_v51 = vpop.eup %1117 }
 0x31d   : > { %v689_v53 = vmul.f32 %v1118_v51, %v687_v52  ;;  %v696_v0 = vsub.f32 1.0, %v1118_v51 }
 0x31f   : > { %691 = vrot.lane.b32.xlu1 %v689_v53, %s1262_s28 }
 0x391   : > { %v692_v54 = vpop.permute.xlu1 %691 }
 0x392   : > { %v694_v55 = vadd.f32 %v692_v54, %v674_v45 }
 0x394   : > { %1119 = vtanh.f32 %v694_v55 }
 0x39e   : > { %v1120_v56 = vpop.eup %1119 }
 0x39f   : > { %698 = vrot.lane.b32.xlu1 %v1120_v56, %s1261_s20 }
 0x3a3   : > { %702 = vrot.lane.b32.xlu1 %v1474_v17, %s1259_s19 }
 0x411   : > { %v699_v63 = vpop.permute.xlu1 %698 }
 0x412   : > { %v701_v2 = vmul.f32 %v699_v63, %v696_v0 }
 0x415   : > { %v703_v1 = vpop.permute.xlu1 %702 }
 0x416   : > { %v705_v3 = vmul.f32 %v1118_v51, %v703_v1 }
 0x418   : > { %v706_v5 = vadd.f32 %v705_v3, %v701_v2 }
 0x41a   : > { %712 = vrot.lane.b32.xlu1 %v706_v5, %s1261_s20 }
 0x41e   : > { %715 = vrot.lane.b32.xlu1 %v592_v42, %s1259_s19 }
 0x422   : > { %800 = vrot.lane.b32.xlu1 %v706_v5, %s1263_s23 }
 0x48c   : > { %v713_v17 = vpop.permute.xlu1 %712 }
 0x48d   : > { %797 = vst.msk [vmem:[#allocation2] sm:$0x3] %vm796_vm5, %v713_v17  ;;  %1008 = vmatmul.mubr.msk.f32.vlgmr.msra.gmra.mrb[4].mxu1 %vm260_vm2, %v713_v17 }
 0x490   : > { %v716_v4 = vpop.permute.xlu1 %715 }
 0x494   : > { %v801_v12 = vpop.permute.xlu1 %800 }
 0x560   : > { %v786_v7 = vpop.f32.mrb[4].mxu1 }
 0x561   : > { %v787_v8 = vadd.f32 %v786_v7, %v716_v4  ;;  %v1009_v10 = vpop.f32.mrb[5].mxu1 }
 0x563   : > { %v794_v11 = vadd.f32 %v932_v6, %v787_v8 }
 0x565   : > { %799 = vst.msk [vmem:[%s1458_s18] sm:$0x3] %vm798_vm6, %v794_v11 }
 0x566   : > { %804 = vst.msk [vmem:[%s1458_s18] sm:$0x3] %vm803_vm7, %v801_v12 }
 0x567   : > { %821 = vst.msk [vmem:[%s1458_s18] sm:$0x3] %vm820_vm8, %v1514_v30 }
 0x568   : > { %823 = vst.msk [vmem:[%s1458_s18] sm:$0x3] %vm822_vm9, %v1258_v9 }
 0x569 PF: > { %p13_p4 = scmp.ge.s32.totalorder %s1383_s5, 7   ;;  %s1563_s15 = smov %s1241_s16 }
 0x56a   : > { %s1564_s16 = smov %s1245_s17  ;;  %s1565_s17 = smov %s1394_s8 }
 0x56b   : > { %s1566_s18 = smov %s1383_s5  ;;  %15 = sbr.rel (!%p13_p4) target bundleno = 3 (0x3), region = 87 }
 0x572   :  { %843 = vsyncpa [#allocation4], 1 }
 0x573   :  { %845 = vsyncpa [#allocation4 + $0x1], 1 }
 0x574   :  { %846 = vsyncpa [#allocation6], 1 }

</bundles_post_ra>
